<compile_context>
chip_gen: v7x
topology: tpu7x:2x2x1
jax: 0.10.0
libtpu: 0.0.40
codegen_flags: <defaults>
</compile_context>

<pallas_src>
import jax
import jax.numpy as jnp
from jax.experimental import pallas as pl
from jax.experimental.pallas import tpu as pltpu

LANE = 128


def _round_up(x, m):
    return ((x + m - 1) // m) * m


def _sigmoid(x):
    # sigmoid(x) = 0.5*(tanh(x/2)+1): one EUP op, no divide, overflow-safe.
    return 0.5 * (jnp.tanh(0.5 * x) + 1.0)


def _decoder_kernel(enc_ref, h_ref, c_ref,
                    wattn_ref, va_ref, wgate_ref, b_ref, wfc_t_ref, bfc_ref,
                    pred_ref, hc_ref):
    """One decode step for a bb-row batch block.

    enc_ref : (bb,S,H) f32      wattn_ref : (2,H,H)   bf16  [0]=W^T [1]=U^T
    h_ref   : (L,bb,H) f32      wgate_ref : (L,2H,4H) bf16  [x ; h] -> i|f|g|o
    c_ref   : (L,bb,H) f32      b_ref     : (L,1,4H)  f32   (b_ih + b_hh)
    va_ref  : (1,H)    f32      wfc_t_ref : (H,Opad)  bf16
    bfc_ref : (1,Opad) f32
    pred_ref: (bb,Opad)  f32  lane-dense, sliced to O outside the kernel
    hc_ref  : (bb,HCpad) f32  lane-dense packed [h_0..h_{L-1} | c_0..c_{L-1} | 0]
    """
    L, B, H = h_ref.shape
    S = enc_ref.shape[1]
    f32, bf16 = jnp.float32, jnp.bfloat16

    enc = enc_ref[...]                                          # (B,S,H) f32
    dh = h_ref[L - 1]                                           # (B,H) == h[-1]

    # ---- Temporal attention (bf16 MXU inputs, f32 accumulate) ----------------
    hproj = jnp.dot(dh.astype(bf16), wattn_ref[0],
                    preferred_element_type=f32)                 # (B,H)
    # NOTE: U @ enc is decode-step invariant; for an autoregressive multi-step
    # decode move the step loop in-kernel and hoist this (dominant) matmul.
    uproj = jnp.dot(enc.reshape(B * S, H).astype(bf16), wattn_ref[1],
                    preferred_element_type=f32).reshape(B, S, H)
    t = jnp.tanh(hproj[:, None, :] + uproj)                     # (B,S,H) f32
    # S is tiny here; for production S, tile over S with an online softmax and
    # move the score/context contractions onto the MXU (einsum 'bks,bsh->bkh').
    scores = jnp.sum(t * va_ref[...], axis=-1)                  # (B,S)
    m = jnp.max(scores, axis=1, keepdims=True)
    e = jnp.exp(scores - m)
    attn = e * pl.reciprocal(jnp.sum(e, axis=1, keepdims=True), approx=True)
    context = jnp.sum(attn[:, :, None] * enc, axis=1)           # (B,H)

    # ---- Multi-layer LSTM, one time step -------------------------------------
    # One fused, lane-dense (B,4H) gate matmul per layer: [x ; h_l] @ Wgate_l.
    # TODO(synk): nn.LSTM inter-layer dropout is a no-op in eval mode; skipped.
    # TODO(synk): for large L switch to lax.fori_loop(..., unroll=True) to bound
    #             vreg live ranges.
    x_in = context
    h_new_parts, c_new_parts = [], []
    for l in range(L):
        hl = h_ref[l]                                           # (B,H) f32
        cl = c_ref[l]                                           # (B,H) f32
        xh = jnp.concatenate([x_in, hl], axis=-1).astype(bf16)  # (B,2H)
        gates = (jnp.dot(xh, wgate_ref[l], preferred_element_type=f32)
                 + b_ref[l])                                    # (B,4H) f32
        i_g = _sigmoid(gates[:, 0 * H:1 * H])
        f_g = _sigmoid(gates[:, 1 * H:2 * H])
        g_g = jnp.tanh(gates[:, 2 * H:3 * H])
        o_g = _sigmoid(gates[:, 3 * H:4 * H])
        c_new = f_g * cl + i_g * g_g
        h_new = o_g * jnp.tanh(c_new)
        h_new_parts.append(h_new)
        c_new_parts.append(c_new)
        x_in = h_new

    # ---- Lane-dense packed state output (single unmasked store) --------------
    hc_pad = hc_ref.shape[1]
    used = 2 * L * H
    parts = h_new_parts + c_new_parts
    if hc_pad > used:
        parts.append(jnp.zeros((B, hc_pad - used), f32))
    hc_ref[...] = jnp.concatenate(parts, axis=-1)

    # ---- Final projection (output padded to a full 128-lane slab) ------------
    pred_ref[...] = (jnp.dot(x_in.astype(bf16), wfc_t_ref[...],
                             preferred_element_type=f32) + bfc_ref[...])


def _pick_batch_block(B, S, H, L, o_pad, hc_pad):
    """VMEM-budgeted batch block size.

    * multiple of 8 (sublane tiling), capped at 256 rows,
    * double-buffered per-block I/O plus resident attention intermediates kept
      under ~20 MiB (headroom inside v7x's 64 MiB VMEM),
    * at least 2 grid steps when B >= 16 so the ("parallel",) axis can shard
      across both v7x TensorCores,
    * must tile B exactly.
    """
    if B % 8 != 0:
        return B                               # tiny/ragged batch: one block
    per_row = 4 * (2 * (S * H + 2 * L * H + o_pad + hc_pad) + 3 * S * H)
    budget = 20 * 1024 * 1024
    bb = min(B, 256, max(8, budget // max(per_row, 1) // 8 * 8))
    if B >= 16:                                # keep both v7x TensorCores busy
        bb = min(bb, max(8, (B // 2) // 8 * 8))
    while B % bb != 0:
        bb -= 8
    return bb


def _vmem_limit_bytes(bb, S, H, L, o_pad, hc_pad):
    """Explicit scoped-VMEM budget from the actual buffer sizes."""
    weights = (2 * (2 * H * H + L * 2 * H * 4 * H + H * o_pad)   # bf16 weights
               + 4 * (H + L * 4 * H + o_pad))                     # f32 biases
    io_blocks = 4 * bb * (S * H + 2 * L * H + o_pad + hc_pad)
    interm = 4 * bb * (3 * S * H + 10 * H)
    est = 2 * (weights + io_blocks) + interm                      # x2 buffering
    return int(min(48 * 1024 * 1024, max(32 * 1024 * 1024, 2 * est)))


def make_decoder_forward(params):
    """One-time (model-load) weight re-layout + jitted forward.

    * attention W^T / U^T stacked into one (2,H,H) bf16 slab,
    * LSTM gate weights fused to (L,2H,4H) = [W_ih^T ; W_hh^T] (one MXU push
      per layer on [x ; h_l]), both biases pre-summed,
    * fc weight/bias zero-padded to a 128-lane output slab,
    * all matmul weights stored bf16; activations / element-wise math stay f32.
    """
    f32, bf16 = jnp.float32, jnp.bfloat16
    L = params["w_ih"].shape[0]
    H = params["wa"].shape[0]
    O = params["w_fc"].shape[0]
    o_pad = _round_up(O, LANE)
    hc_pad = _round_up(2 * L * H, LANE)

    wattn = jnp.stack([jnp.asarray(params["wa"], f32).T,
                       jnp.asarray(params["ua"], f32).T]).astype(bf16)   # (2,H,H)
    va = jnp.asarray(params["va"], f32).reshape(1, H)
    wih_t = jnp.transpose(jnp.asarray(params["w_ih"], f32), (0, 2, 1))   # (L,H,4H)
    whh_t = jnp.transpose(jnp.asarray(params["w_hh"], f32), (0, 2, 1))   # (L,H,4H)
    wgate = jnp.concatenate([wih_t, whh_t], axis=1).astype(bf16)         # (L,2H,4H)
    b = (params["b_ih"] + params["b_hh"]).astype(f32).reshape(L, 1, 4 * H)
    wfc_t = (jnp.zeros((H, o_pad), f32)
             .at[:, :O].set(jnp.asarray(params["w_fc"], f32).T)).astype(bf16)
    bfc = jnp.zeros((1, o_pad), f32).at[:, :O].set(
        jnp.asarray(params["b_fc"], f32).reshape(1, O))

    @jax.jit
    def forward(encoder_outputs, h, c):
        B, S, _ = encoder_outputs.shape
        bb = _pick_batch_block(B, S, H, L, o_pad, hc_pad)
        nb = B // bb

        in_specs = [
            pl.BlockSpec((bb, S, H), lambda i: (i, 0, 0)),           # encoder_outputs
            pl.BlockSpec((L, bb, H), lambda i: (0, i, 0)),           # h
            pl.BlockSpec((L, bb, H), lambda i: (0, i, 0)),           # c
            # Constant-index weight blocks.  TODO(synk): single-buffer these with
            # pipeline_mode=pl.Buffered(1) when targeting v7x production sizes.
            pl.BlockSpec((2, H, H), lambda i: (0, 0, 0)),            # wattn (bf16)
            pl.BlockSpec((1, H), lambda i: (0, 0)),                  # va
            pl.BlockSpec((L, 2 * H, 4 * H), lambda i: (0, 0, 0)),    # wgate (bf16)
            pl.BlockSpec((L, 1, 4 * H), lambda i: (0, 0, 0)),        # b (pre-summed)
            pl.BlockSpec((H, o_pad), lambda i: (0, 0)),              # wfc_t (bf16)
            pl.BlockSpec((1, o_pad), lambda i: (0, 0)),              # bfc
        ]
        out_specs = (
            pl.BlockSpec((bb, o_pad), lambda i: (i, 0)),             # pred (padded)
            pl.BlockSpec((bb, hc_pad), lambda i: (i, 0)),            # packed h|c
        )

        pred_pad, hc = pl.pallas_call(
            _decoder_kernel,
            out_shape=(
                jax.ShapeDtypeStruct((B, o_pad), f32),
                jax.ShapeDtypeStruct((B, hc_pad), f32),
            ),
            grid=(nb,),
            in_specs=in_specs,
            out_specs=out_specs,
            compiler_params=pltpu.CompilerParams(
                dimension_semantics=("parallel",),
                vmem_limit_bytes=_vmem_limit_bytes(bb, S, H, L, o_pad, hc_pad)),
        )(encoder_outputs, h, c, wattn, va, wgate, b, wfc_t, bfc)

        prediction = pred_pad[:, :O]
        h_out = hc[:, :L * H].reshape(B, L, H).transpose(1, 0, 2)
        c_out = hc[:, L * H:2 * L * H].reshape(B, L, H).transpose(1, 0, 2)
        return prediction, (h_out, c_out)

    return forward


# ---------------- pure-JAX reference (for correctness check) -----------------
def reference_forward(enc, h, c, p):
    L, B, H = h.shape
    dh = h[-1]
    hproj = dh @ p["wa"].T
    uproj = enc @ p["ua"].T
    scores = jnp.tanh(hproj[:, None, :] + uproj) @ p["va"].T        # (B,S,1)
    attn = jax.nn.softmax(scores, axis=1)
    context = jnp.sum(attn * enc, axis=1)
    x_in = context
    hs, cs = [], []
    for l in range(L):
        gates = (x_in @ p["w_ih"][l].T + p["b_ih"][l]
                 + h[l] @ p["w_hh"][l].T + p["b_hh"][l])
        i, f, g, o = jnp.split(gates, 4, axis=1)
        i, f, g, o = jax.nn.sigmoid(i), jax.nn.sigmoid(f), jnp.tanh(g), jax.nn.sigmoid(o)
        cn = f * c[l] + i * g
        hn = o * jnp.tanh(cn)
        hs.append(hn); cs.append(cn)
        x_in = hn
    pred = x_in @ p["w_fc"].T + p["b_fc"]
    return pred, (jnp.stack(hs), jnp.stack(cs))


if __name__ == "__main__":
    H, L, O = 32, 2, 4
    key = jax.random.PRNGKey(0)
    ks = jax.random.split(key, 16)
    k_bound = float(1.0 / jnp.sqrt(H))

    def u(k, shape):
        return jax.random.uniform(k, shape, jnp.float32, -k_bound, k_bound)

    params = {
        "wa": u(ks[0], (H, H)),
        "ua": u(ks[1], (H, H)),
        "va": u(ks[2], (1, H)),
        "w_ih": u(ks[3], (L, 4 * H, H)),
        "w_hh": u(ks[4], (L, 4 * H, H)),
        "b_ih": u(ks[5], (L, 4 * H)),
        "b_hh": u(ks[6], (L, 4 * H)),
        "w_fc": u(ks[7], (O, H)),
        "b_fc": u(ks[8], (O,)),
    }

    decoder_forward = make_decoder_forward(params)   # one-time weight prep + jit

    # bf16 MXU inputs / f32 accumulation -> compare at bf16-chain tolerance.
    TOL = dict(atol=5e-3, rtol=5e-3)

    # Small shapes matching the module spec (degenerate single-block grid).
    B, S = 2, 8
    enc = jax.random.normal(ks[9], (B, S, H), jnp.float32)
    h0 = jax.random.normal(ks[10], (L, B, H), jnp.float32)
    c0 = jax.random.normal(ks[11], (L, B, H), jnp.float32)
    pred, (h_out, c_out) = decoder_forward(enc, h0, c0)
    jax.block_until_ready((pred, h_out, c_out))
    pred_r, (h_r, c_r) = reference_forward(enc, h0, c0, params)
    assert pred.shape == (B, O)
    assert jnp.allclose(pred, pred_r, **TOL)
    assert jnp.allclose(h_out, h_r, **TOL)
    assert jnp.allclose(c_out, c_r, **TOL)

    # Larger batch: exercises the multi-block ("parallel",) grid path (bb=8, 2 steps).
    B2 = 16
    enc2 = jax.random.normal(ks[12], (B2, S, H), jnp.float32)
    h2 = jax.random.normal(ks[13], (L, B2, H), jnp.float32)
    c2 = jax.random.normal(ks[14], (L, B2, H), jnp.float32)
    pred2, (h_out2, c_out2) = decoder_forward(enc2, h2, c2)
    jax.block_until_ready((pred2, h_out2, c_out2))
    pred2_r, (h2_r, c2_r) = reference_forward(enc2, h2, c2, params)
    assert jnp.allclose(pred2, pred2_r, **TOL)
    assert jnp.allclose(h_out2, h2_r, **TOL)
    assert jnp.allclose(c_out2, c2_r, **TOL)

    print("KERNEL_OK")
</pallas_src>

<mosaic_0001>
module attributes {stable_mosaic.version = 11 : i64} {
  func.func @_decoder_kernel(%arg0: i32, %arg1: memref<2x8x32xf32, #tpu.memory_space<vmem>>, %arg2: memref<2x2x32xf32, #tpu.memory_space<vmem>>, %arg3: memref<2x2x32xf32, #tpu.memory_space<vmem>>, %arg4: memref<2x32x32xbf16, #tpu.memory_space<vmem>>, %arg5: memref<1x32xf32, #tpu.memory_space<vmem>>, %arg6: memref<2x64x128xbf16, #tpu.memory_space<vmem>>, %arg7: memref<2x1x128xf32, #tpu.memory_space<vmem>>, %arg8: memref<32x128xbf16, #tpu.memory_space<vmem>>, %arg9: memref<1x128xf32, #tpu.memory_space<vmem>>, %arg10: memref<2x128xf32, #tpu.memory_space<vmem>>, %arg11: memref<2x128xf32, #tpu.memory_space<vmem>>) attributes {dimension_semantics = [#tpu.dimension_semantics<parallel>], iteration_bounds = array<i64: 1>, scalar_prefetch = 0 : i64, scratch_operands = 0 : i64, tpu.core_type = #tpu.core_type<tc>, window_params = [{transform_indices = @transform_0, window_bounds = array<i64: 2, 8, 32>}, {transform_indices = @transform_1, window_bounds = array<i64: 2, 2, 32>}, {transform_indices = @transform_2, window_bounds = array<i64: 2, 2, 32>}, {pipeline_mode = #tpu.pipeline_mode<synchronous>, transform_indices = @transform_3, window_bounds = array<i64: 2, 32, 32>}, {pipeline_mode = #tpu.pipeline_mode<synchronous>, transform_indices = @transform_4, window_bounds = array<i64: 1, 32>}, {pipeline_mode = #tpu.pipeline_mode<synchronous>, transform_indices = @transform_5, window_bounds = array<i64: 2, 64, 128>}, {pipeline_mode = #tpu.pipeline_mode<synchronous>, transform_indices = @transform_6, window_bounds = array<i64: 2, 1, 128>}, {pipeline_mode = #tpu.pipeline_mode<synchronous>, transform_indices = @transform_7, window_bounds = array<i64: 32, 128>}, {pipeline_mode = #tpu.pipeline_mode<synchronous>, transform_indices = @transform_8, window_bounds = array<i64: 1, 128>}, {transform_indices = @transform_9, window_bounds = array<i64: 2, 128>}, {transform_indices = @transform_10, window_bounds = array<i64: 2, 128>}]} {
    %c0 = arith.constant 0 : index
    %c0_0 = arith.constant 0 : index
    %c0_1 = arith.constant 0 : index
    %0 = vector.load %arg1[%c0, %c0_0, %c0_1] : memref<2x8x32xf32, #tpu.memory_space<vmem>>, vector<2x8x32xf32>
    %c1 = arith.constant 1 : index
    %c0_2 = arith.constant 0 : index
    %c0_3 = arith.constant 0 : index
    %1 = vector.load %arg2[%c1, %c0_2, %c0_3] : memref<2x2x32xf32, #tpu.memory_space<vmem>>, vector<1x2x32xf32>
    %2 = vector.shape_cast %1 : vector<1x2x32xf32> to vector<2x32xf32>
    %3 = arith.truncf %2 : vector<2x32xf32> to vector<2x32xbf16>
    %c0_4 = arith.constant 0 : index
    %c0_5 = arith.constant 0 : index
    %c0_6 = arith.constant 0 : index
    %4 = vector.load %arg4[%c0_4, %c0_5, %c0_6] : memref<2x32x32xbf16, #tpu.memory_space<vmem>>, vector<1x32x32xbf16>
    %5 = vector.shape_cast %4 : vector<1x32x32xbf16> to vector<32x32xbf16>
    %cst = arith.constant dense<0.000000e+00> : vector<2x32xf32>
    %6 = tpu.matmul %3, %5, %cst {dimension_numbers = #tpu.dot_dimension_numbers<[1], [0], [0], [1], [0, 0, 1, 1], [], []>} : vector<2x32xbf16>, vector<32x32xbf16>, vector<2x32xf32> -> vector<2x32xf32>
    %7 = vector.shape_cast %0 : vector<2x8x32xf32> to vector<16x32xf32>
    %8 = arith.truncf %7 : vector<16x32xf32> to vector<16x32xbf16>
    %c1_7 = arith.constant 1 : index
    %c0_8 = arith.constant 0 : index
    %c0_9 = arith.constant 0 : index
    %9 = vector.load %arg4[%c1_7, %c0_8, %c0_9] : memref<2x32x32xbf16, #tpu.memory_space<vmem>>, vector<1x32x32xbf16>
    %10 = vector.shape_cast %9 : vector<1x32x32xbf16> to vector<32x32xbf16>
    %cst_10 = arith.constant dense<0.000000e+00> : vector<16x32xf32>
    %11 = tpu.matmul %8, %10, %cst_10 {dimension_numbers = #tpu.dot_dimension_numbers<[1], [0], [0], [1], [0, 0, 1, 1], [], []>} : vector<16x32xbf16>, vector<32x32xbf16>, vector<16x32xf32> -> vector<16x32xf32>
    %12 = vector.shape_cast %11 : vector<16x32xf32> to vector<2x8x32xf32>
    %13 = vector.shape_cast %6 : vector<2x32xf32> to vector<2x1x32xf32>
    %14 = vector.broadcast %13 : vector<2x1x32xf32> to vector<2x8x32xf32>
    %15 = arith.addf %14, %12 : vector<2x8x32xf32>
    %16 = math.tanh %15 : vector<2x8x32xf32>
    %c0_11 = arith.constant 0 : index
    %c0_12 = arith.constant 0 : index
    %17 = vector.load %arg5[%c0_11, %c0_12] : memref<1x32xf32, #tpu.memory_space<vmem>>, vector<1x32xf32>
    %18 = vector.shape_cast %17 : vector<1x32xf32> to vector<1x1x32xf32>
    %19 = vector.broadcast %18 : vector<1x1x32xf32> to vector<2x8x32xf32>
    %20 = arith.mulf %16, %19 : vector<2x8x32xf32>
    %cst_13 = arith.constant dense<0.000000e+00> : vector<2x8xf32>
    %21 = vector.multi_reduction <add>, %20, %cst_13 [2] : vector<2x8x32xf32> to vector<2x8xf32>
    %cst_14 = arith.constant dense<0xFF800000> : vector<2xf32>
    %22 = vector.multi_reduction <maximumf>, %21, %cst_14 [1] : vector<2x8xf32> to vector<2xf32>
    %23 = vector.shape_cast %22 : vector<2xf32> to vector<2x1xf32>
    %24 = vector.broadcast %23 : vector<2x1xf32> to vector<2x8xf32>
    %25 = arith.subf %21, %24 : vector<2x8xf32>
    %26 = math.exp %25 : vector<2x8xf32>
    %cst_15 = arith.constant dense<0.000000e+00> : vector<2xf32>
    %27 = vector.multi_reduction <add>, %26, %cst_15 [1] : vector<2x8xf32> to vector<2xf32>
    %28 = vector.shape_cast %27 : vector<2xf32> to vector<2x1xf32>
    %29 = tpu.reciprocal %28 {approx = true} : vector<2x1xf32> -> vector<2x1xf32>
    %30 = vector.broadcast %29 : vector<2x1xf32> to vector<2x8xf32>
    %31 = arith.mulf %26, %30 : vector<2x8xf32>
    %32 = vector.shape_cast %31 : vector<2x8xf32> to vector<2x8x1xf32>
    %33 = vector.broadcast %32 : vector<2x8x1xf32> to vector<2x8x32xf32>
    %34 = arith.mulf %33, %0 : vector<2x8x32xf32>
    %cst_16 = arith.constant dense<0.000000e+00> : vector<2x32xf32>
    %35 = vector.multi_reduction <add>, %34, %cst_16 [1] : vector<2x8x32xf32> to vector<2x32xf32>
    %c0_17 = arith.constant 0 : index
    %c0_18 = arith.constant 0 : index
    %c0_19 = arith.constant 0 : index
    %36 = vector.load %arg2[%c0_17, %c0_18, %c0_19] : memref<2x2x32xf32, #tpu.memory_space<vmem>>, vector<1x2x32xf32>
    %37 = vector.shape_cast %36 : vector<1x2x32xf32> to vector<2x32xf32>
    %c0_20 = arith.constant 0 : index
    %c0_21 = arith.constant 0 : index
    %c0_22 = arith.constant 0 : index
    %38 = vector.load %arg3[%c0_20, %c0_21, %c0_22] : memref<2x2x32xf32, #tpu.memory_space<vmem>>, vector<1x2x32xf32>
    %39 = vector.shape_cast %38 : vector<1x2x32xf32> to vector<2x32xf32>
    %40 = tpu.concatenate %35, %37 in 1 : vector<2x32xf32>, vector<2x32xf32> -> vector<2x64xf32>
    %41 = arith.truncf %40 : vector<2x64xf32> to vector<2x64xbf16>
    %c0_23 = arith.constant 0 : index
    %c0_24 = arith.constant 0 : index
    %c0_25 = arith.constant 0 : index
    %42 = vector.load %arg6[%c0_23, %c0_24, %c0_25] : memref<2x64x128xbf16, #tpu.memory_space<vmem>>, vector<1x64x128xbf16>
    %43 = vector.shape_cast %42 : vector<1x64x128xbf16> to vector<64x128xbf16>
    %cst_26 = arith.constant dense<0.000000e+00> : vector<2x128xf32>
    %44 = tpu.matmul %41, %43, %cst_26 {dimension_numbers = #tpu.dot_dimension_numbers<[1], [0], [0], [1], [0, 0, 1, 1], [], []>} : vector<2x64xbf16>, vector<64x128xbf16>, vector<2x128xf32> -> vector<2x128xf32>
    %c0_27 = arith.constant 0 : index
    %c0_28 = arith.constant 0 : index
    %c0_29 = arith.constant 0 : index
    %45 = vector.load %arg7[%c0_27, %c0_28, %c0_29] : memref<2x1x128xf32, #tpu.memory_space<vmem>>, vector<1x1x128xf32>
    %46 = vector.shape_cast %45 : vector<1x1x128xf32> to vector<1x128xf32>
    %47 = vector.broadcast %46 : vector<1x128xf32> to vector<2x128xf32>
    %48 = arith.addf %44, %47 : vector<2x128xf32>
    %49 = vector.extract_strided_slice %48 {offsets = [0, 0], sizes = [2, 32], strides = [1, 1]} : vector<2x128xf32> to vector<2x32xf32>
    %cst_30 = arith.constant 5.000000e-01 : f32
    %50 = vector.broadcast %cst_30 : f32 to vector<2x32xf32>
    %51 = arith.mulf %50, %49 : vector<2x32xf32>
    %52 = math.tanh %51 : vector<2x32xf32>
    %cst_31 = arith.constant 1.000000e+00 : f32
    %53 = vector.broadcast %cst_31 : f32 to vector<2x32xf32>
    %54 = arith.addf %52, %53 : vector<2x32xf32>
    %cst_32 = arith.constant 5.000000e-01 : f32
    %55 = vector.broadcast %cst_32 : f32 to vector<2x32xf32>
    %56 = arith.mulf %55, %54 : vector<2x32xf32>
    %57 = vector.extract_strided_slice %48 {offsets = [0, 32], sizes = [2, 32], strides = [1, 1]} : vector<2x128xf32> to vector<2x32xf32>
    %cst_33 = arith.constant 5.000000e-01 : f32
    %58 = vector.broadcast %cst_33 : f32 to vector<2x32xf32>
    %59 = arith.mulf %58, %57 : vector<2x32xf32>
    %60 = math.tanh %59 : vector<2x32xf32>
    %cst_34 = arith.constant 1.000000e+00 : f32
    %61 = vector.broadcast %cst_34 : f32 to vector<2x32xf32>
    %62 = arith.addf %60, %61 : vector<2x32xf32>
    %cst_35 = arith.constant 5.000000e-01 : f32
    %63 = vector.broadcast %cst_35 : f32 to vector<2x32xf32>
    %64 = arith.mulf %63, %62 : vector<2x32xf32>
    %65 = vector.extract_strided_slice %48 {offsets = [0, 64], sizes = [2, 32], strides = [1, 1]} : vector<2x128xf32> to vector<2x32xf32>
    %66 = math.tanh %65 : vector<2x32xf32>
    %67 = vector.extract_strided_slice %48 {offsets = [0, 96], sizes = [2, 32], strides = [1, 1]} : vector<2x128xf32> to vector<2x32xf32>
    %cst_36 = arith.constant 5.000000e-01 : f32
    %68 = vector.broadcast %cst_36 : f32 to vector<2x32xf32>
    %69 = arith.mulf %68, %67 : vector<2x32xf32>
    %70 = math.tanh %69 : vector<2x32xf32>
    %cst_37 = arith.constant 1.000000e+00 : f32
    %71 = vector.broadcast %cst_37 : f32 to vector<2x32xf32>
    %72 = arith.addf %70, %71 : vector<2x32xf32>
    %cst_38 = arith.constant 5.000000e-01 : f32
    %73 = vector.broadcast %cst_38 : f32 to vector<2x32xf32>
    %74 = arith.mulf %73, %72 : vector<2x32xf32>
    %75 = arith.mulf %64, %39 : vector<2x32xf32>
    %76 = arith.mulf %56, %66 : vector<2x32xf32>
    %77 = arith.addf %75, %76 : vector<2x32xf32>
    %78 = math.tanh %77 : vector<2x32xf32>
    %79 = arith.mulf %74, %78 : vector<2x32xf32>
    %c1_39 = arith.constant 1 : index
    %c0_40 = arith.constant 0 : index
    %c0_41 = arith.constant 0 : index
    %80 = vector.load %arg2[%c1_39, %c0_40, %c0_41] : memref<2x2x32xf32, #tpu.memory_space<vmem>>, vector<1x2x32xf32>
    %81 = vector.shape_cast %80 : vector<1x2x32xf32> to vector<2x32xf32>
    %c1_42 = arith.constant 1 : index
    %c0_43 = arith.constant 0 : index
    %c0_44 = arith.constant 0 : index
    %82 = vector.load %arg3[%c1_42, %c0_43, %c0_44] : memref<2x2x32xf32, #tpu.memory_space<vmem>>, vector<1x2x32xf32>
    %83 = vector.shape_cast %82 : vector<1x2x32xf32> to vector<2x32xf32>
    %84 = tpu.concatenate %79, %81 in 1 : vector<2x32xf32>, vector<2x32xf32> -> vector<2x64xf32>
    %85 = arith.truncf %84 : vector<2x64xf32> to vector<2x64xbf16>
    %c1_45 = arith.constant 1 : index
    %c0_46 = arith.constant 0 : index
    %c0_47 = arith.constant 0 : index
    %86 = vector.load %arg6[%c1_45, %c0_46, %c0_47] : memref<2x64x128xbf16, #tpu.memory_space<vmem>>, vector<1x64x128xbf16>
    %87 = vector.shape_cast %86 : vector<1x64x128xbf16> to vector<64x128xbf16>
    %cst_48 = arith.constant dense<0.000000e+00> : vector<2x128xf32>
    %88 = tpu.matmul %85, %87, %cst_48 {dimension_numbers = #tpu.dot_dimension_numbers<[1], [0], [0], [1], [0, 0, 1, 1], [], []>} : vector<2x64xbf16>, vector<64x128xbf16>, vector<2x128xf32> -> vector<2x128xf32>
    %c1_49 = arith.constant 1 : index
    %c0_50 = arith.constant 0 : index
    %c0_51 = arith.constant 0 : index
    %89 = vector.load %arg7[%c1_49, %c0_50, %c0_51] : memref<2x1x128xf32, #tpu.memory_space<vmem>>, vector<1x1x128xf32>
    %90 = vector.shape_cast %89 : vector<1x1x128xf32> to vector<1x128xf32>
    %91 = vector.broadcast %90 : vector<1x128xf32> to vector<2x128xf32>
    %92 = arith.addf %88, %91 : vector<2x128xf32>
    %93 = vector.extract_strided_slice %92 {offsets = [0, 0], sizes = [2, 32], strides = [1, 1]} : vector<2x128xf32> to vector<2x32xf32>
    %cst_52 = arith.constant 5.000000e-01 : f32
    %94 = vector.broadcast %cst_52 : f32 to vector<2x32xf32>
    %95 = arith.mulf %94, %93 : vector<2x32xf32>
    %96 = math.tanh %95 : vector<2x32xf32>
    %cst_53 = arith.constant 1.000000e+00 : f32
    %97 = vector.broadcast %cst_53 : f32 to vector<2x32xf32>
    %98 = arith.addf %96, %97 : vector<2x32xf32>
    %cst_54 = arith.constant 5.000000e-01 : f32
    %99 = vector.broadcast %cst_54 : f32 to vector<2x32xf32>
    %100 = arith.mulf %99, %98 : vector<2x32xf32>
    %101 = vector.extract_strided_slice %92 {offsets = [0, 32], sizes = [2, 32], strides = [1, 1]} : vector<2x128xf32> to vector<2x32xf32>
    %cst_55 = arith.constant 5.000000e-01 : f32
    %102 = vector.broadcast %cst_55 : f32 to vector<2x32xf32>
    %103 = arith.mulf %102, %101 : vector<2x32xf32>
    %104 = math.tanh %103 : vector<2x32xf32>
    %cst_56 = arith.constant 1.000000e+00 : f32
    %105 = vector.broadcast %cst_56 : f32 to vector<2x32xf32>
    %106 = arith.addf %104, %105 : vector<2x32xf32>
    %cst_57 = arith.constant 5.000000e-01 : f32
    %107 = vector.broadcast %cst_57 : f32 to vector<2x32xf32>
    %108 = arith.mulf %107, %106 : vector<2x32xf32>
    %109 = vector.extract_strided_slice %92 {offsets = [0, 64], sizes = [2, 32], strides = [1, 1]} : vector<2x128xf32> to vector<2x32xf32>
    %110 = math.tanh %109 : vector<2x32xf32>
    %111 = vector.extract_strided_slice %92 {offsets = [0, 96], sizes = [2, 32], strides = [1, 1]} : vector<2x128xf32> to vector<2x32xf32>
    %cst_58 = arith.constant 5.000000e-01 : f32
    %112 = vector.broadcast %cst_58 : f32 to vector<2x32xf32>
    %113 = arith.mulf %112, %111 : vector<2x32xf32>
    %114 = math.tanh %113 : vector<2x32xf32>
    %cst_59 = arith.constant 1.000000e+00 : f32
    %115 = vector.broadcast %cst_59 : f32 to vector<2x32xf32>
    %116 = arith.addf %114, %115 : vector<2x32xf32>
    %cst_60 = arith.constant 5.000000e-01 : f32
    %117 = vector.broadcast %cst_60 : f32 to vector<2x32xf32>
    %118 = arith.mulf %117, %116 : vector<2x32xf32>
    %119 = arith.mulf %108, %83 : vector<2x32xf32>
    %120 = arith.mulf %100, %110 : vector<2x32xf32>
    %121 = arith.addf %119, %120 : vector<2x32xf32>
    %122 = math.tanh %121 : vector<2x32xf32>
    %123 = arith.mulf %118, %122 : vector<2x32xf32>
    %124 = tpu.concatenate %79, %123, %77, %121 in 1 : vector<2x32xf32>, vector<2x32xf32>, vector<2x32xf32>, vector<2x32xf32> -> vector<2x128xf32>
    %c0_61 = arith.constant 0 : index
    %c0_62 = arith.constant 0 : index
    %125 = vector.load %arg11[%c0_61, %c0_62] : memref<2x128xf32, #tpu.memory_space<vmem>>, vector<2x128xf32>
    tpu.vector_store %arg11[%c0_61, %c0_62], %124 {strides = array<i32>} : memref<2x128xf32, #tpu.memory_space<vmem>>, vector<2x128xf32>,
    %126 = arith.truncf %123 : vector<2x32xf32> to vector<2x32xbf16>
    %c0_63 = arith.constant 0 : index
    %c0_64 = arith.constant 0 : index
    %127 = vector.load %arg8[%c0_63, %c0_64] : memref<32x128xbf16, #tpu.memory_space<vmem>>, vector<32x128xbf16>
    %cst_65 = arith.constant dense<0.000000e+00> : vector<2x128xf32>
    %128 = tpu.matmul %126, %127, %cst_65 {dimension_numbers = #tpu.dot_dimension_numbers<[1], [0], [0], [1], [0, 0, 1, 1], [], []>} : vector<2x32xbf16>, vector<32x128xbf16>, vector<2x128xf32> -> vector<2x128xf32>
    %c0_66 = arith.constant 0 : index
    %c0_67 = arith.constant 0 : index
    %129 = vector.load %arg9[%c0_66, %c0_67] : memref<1x128xf32, #tpu.memory_space<vmem>>, vector<1x128xf32>
    %130 = vector.broadcast %129 : vector<1x128xf32> to vector<2x128xf32>
    %131 = arith.addf %128, %130 : vector<2x128xf32>
    %c0_68 = arith.constant 0 : index
    %c0_69 = arith.constant 0 : index
    %132 = vector.load %arg10[%c0_68, %c0_69] : memref<2x128xf32, #tpu.memory_space<vmem>>, vector<2x128xf32>
    tpu.vector_store %arg10[%c0_68, %c0_69], %131 {strides = array<i32>} : memref<2x128xf32, #tpu.memory_space<vmem>>, vector<2x128xf32>,
    return
  }
  func.func @transform_0(%arg0: i32) -> (i32, i32, i32) {
    %c0_i32 = arith.constant 0 : i32
    %c0_i32_0 = arith.constant 0 : i32
    %c0_i32_1 = arith.constant 0 : i32
    return %arg0, %c0_i32, %c0_i32_0 : i32, i32, i32
  }
  func.func @transform_1(%arg0: i32) -> (i32, i32, i32) {
    %c0_i32 = arith.constant 0 : i32
    %c0_i32_0 = arith.constant 0 : i32
    %c0_i32_1 = arith.constant 0 : i32
    return %c0_i32, %arg0, %c0_i32_0 : i32, i32, i32
  }
  func.func @transform_2(%arg0: i32) -> (i32, i32, i32) {
    %c0_i32 = arith.constant 0 : i32
    %c0_i32_0 = arith.constant 0 : i32
    %c0_i32_1 = arith.constant 0 : i32
    return %c0_i32, %arg0, %c0_i32_0 : i32, i32, i32
  }
  func.func @transform_3(%arg0: i32) -> (i32, i32, i32) {
    %c0_i32 = arith.constant 0 : i32
    %c0_i32_0 = arith.constant 0 : i32
    %c0_i32_1 = arith.constant 0 : i32
    %c0_i32_2 = arith.constant 0 : i32
    return %c0_i32, %c0_i32_0, %c0_i32_1 : i32, i32, i32
  }
  func.func @transform_4(%arg0: i32) -> (i32, i32) {
    %c0_i32 = arith.constant 0 : i32
    %c0_i32_0 = arith.constant 0 : i32
    %c0_i32_1 = arith.constant 0 : i32
    return %c0_i32, %c0_i32_0 : i32, i32
  }
  func.func @transform_5(%arg0: i32) -> (i32, i32, i32) {
    %c0_i32 = arith.constant 0 : i32
    %c0_i32_0 = arith.constant 0 : i32
    %c0_i32_1 = arith.constant 0 : i32
    %c0_i32_2 = arith.constant 0 : i32
    return %c0_i32, %c0_i32_0, %c0_i32_1 : i32, i32, i32
  }
  func.func @transform_6(%arg0: i32) -> (i32, i32, i32) {
    %c0_i32 = arith.constant 0 : i32
    %c0_i32_0 = arith.constant 0 : i32
    %c0_i32_1 = arith.constant 0 : i32
    %c0_i32_2 = arith.constant 0 : i32
    return %c0_i32, %c0_i32_0, %c0_i32_1 : i32, i32, i32
  }
  func.func @transform_7(%arg0: i32) -> (i32, i32) {
    %c0_i32 = arith.constant 0 : i32
    %c0_i32_0 = arith.constant 0 : i32
    %c0_i32_1 = arith.constant 0 : i32
    return %c0_i32, %c0_i32_0 : i32, i32
  }
  func.func @transform_8(%arg0: i32) -> (i32, i32) {
    %c0_i32 = arith.constant 0 : i32
    %c0_i32_0 = arith.constant 0 : i32
    %c0_i32_1 = arith.constant 0 : i32
    return %c0_i32, %c0_i32_0 : i32, i32
  }
  func.func @transform_9(%arg0: i32) -> (i32, i32) {
    %c0_i32 = arith.constant 0 : i32
    %c0_i32_0 = arith.constant 0 : i32
    return %arg0, %c0_i32 : i32, i32
  }
  func.func @transform_10(%arg0: i32) -> (i32, i32) {
    %c0_i32 = arith.constant 0 : i32
    %c0_i32_0 = arith.constant 0 : i32
    return %arg0, %c0_i32 : i32, i32
  }
}

</mosaic_0001>

<bundles_post_ra>
// kernel: forward.1
= control target key start
LH: loop header
LB: loop body
LE: loop exit
PB: predicated region body
PF: predicated region fallthrough
CT: control target
= control target key end

     0   :  { %16 = vsyncpa [#allocation3], 0  ;;  %s1391_s0 = inlined_call_operand.hbm [shape: f32[2,8,32], index: 0, kind: input, shape index: {}]   ;;  %s1392_s1 = inlined_call_operand.hbm [shape: f32[2,2,32], index: 1, kind: input, shape index: {}]   ;;  %s1393_s2 = inlined_call_operand.hbm [shape: f32[2,2,32], index: 2, kind: input, shape index: {}]   ;;  %s1394_s3 = inlined_call_operand.vmem [shape: bf16[2,32,32], index: 3, kind: input, shape index: {}]   ;;  %s1395_s4 = inlined_call_operand.hbm [shape: f32[1,32], index: 4, kind: input, shape index: {}]   ;;  %s1396_s5 = inlined_call_operand.hbm [shape: bf16[2,64,128], index: 5, kind: input, shape index: {}]   ;;  %s1397_s6 = inlined_call_operand.vmem [shape: f32[2,1,128], index: 6, kind: input, shape index: {}]   ;;  %s1398_s7 = inlined_call_operand.hbm [shape: bf16[32,128], index: 7, kind: input, shape index: {}]   ;;  %s1399_s8 = inlined_call_operand.hbm [shape: f32[1,128], index: 8, kind: input, shape index: {}]   ;;  %s1400_s9 = inlined_call_operand.hbm [shape: f32[2,128], index: 9, kind: output, shape index: {0}]   ;;  %s1401_s10 = inlined_call_operand.vmem [shape: f32[2,128], index: 10, kind: output, shape index: {1}]  }
   0x1   :  { %17 = vsyncpa [#allocation6], 0 }
   0x2   :  { %18 = vsyncpa [#allocation9], 0 }
   0x3   :  { %19 = vsyncpa [#allocation12], 0 }
   0x4   :  { %20 = vsyncpa [#allocation4], 0  ;;  %s1093_s13 = smov [#allocation5]   ;;  %s907_s17 = scalar_lea.hbm %s1392_s1, 64 }
   0x5   :  { %s38_s14 = sshll.u32 %s1093_s13, 4  ;;  %p908_p0 = scmp.ne.s32.totalorder %s1392_s1, %s907_s17  ;;  %s39_s14 = int_to_ptr.vmem [resolvable:$true] %s38_s14 }
   0x6   :  { %p911_p1 = scmp.lt.u32.totalorder %s907_s17, %s1392_s1 }
   0x8   :  { %p913_p2 = pnand %p911_p1, %p908_p0 }
   0xa   :  { %916 = shalt.err (!%p913_p2)
}
   0xb   :  { %s917_s22 = scalar_lea.vmem %s39_s14, 64  ;;  %p922_p4 = scmp.lt.s32.totalorder %s39_s14, %s39_s14 }
   0xc   :  { %p918_p3 = scmp.ne.s32.totalorder %s39_s14, %s917_s22  ;;  %p923_p5 = scmp.lt.s32.totalorder %s917_s22, %s917_s22 }
   0xe   :  { %p924_p6 = por %p923_p5, %p922_p4 }
  0x10   :  { %p925_p7 = pnand %p924_p6, %p918_p3 }
  0x12   :  { %928 = shalt.err (!%p925_p7)
}
  0x13   :  { %s1094_s23 = smov 32   ;;  %s1095_s24 = smov 2  }
  0x14   :  { %44 = dma.hbm_to_vmem [thread:$0]  %s1392_s1, 64, %s39_s14, [#allocation6], %s1094_s23, %s1094_s23, %s1095_s24  }
  0x15   :  { %s1096_s27 = smov [#allocation8]   ;;  %s929_s11 = scalar_lea.hbm %s1395_s4, 16 }
  0x16   :  { %s65_s28 = sshll.u32 %s1096_s27, 4  ;;  %p930_p8 = scmp.ne.s32.totalorder %s1395_s4, %s929_s11  ;;  %s66_s28 = int_to_ptr.vmem [resolvable:$true] %s65_s28 }
  0x17   :  { %p933_p9 = scmp.lt.u32.totalorder %s929_s11, %s1395_s4 }
  0x19   :  { %p935_p10 = pnand %p933_p9, %p930_p8 }
  0x1b   :  { %938 = shalt.err (!%p935_p10)
}
  0x1c   :  { %s939_s17 = scalar_lea.vmem %s66_s28, 16  ;;  %s943_s1 = scalar_lea.vmem %s66_s28, 32 }
  0x1d   :  { %p940_p11 = scmp.ne.s32.totalorder %s66_s28, %s939_s17  ;;  %p944_p12 = scmp.lt.s32.totalorder %s66_s28, %s66_s28 }
  0x1e   :  { %p945_p13 = scmp.lt.s32.totalorder %s943_s1, %s939_s17 }
  0x20   :  { %p946_p0 = por %p945_p13, %p944_p12 }
  0x22   :  { %p947_p1 = pnand %p946_p0, %p940_p11 }
  0x24   :  { %950 = shalt.err (!%p947_p1)
}
  0x25   :  { %68 = dma.hbm_to_vmem [thread:$0]  %s1395_s4, 16, %s66_s28, [#allocation9]  }
  0x26   :  { %s1097_s19 = smov [#allocation11]   ;;  %s1098_s21 = smov [#allocation2]  }
  0x27   :  { %s88_s20 = sshll.u32 %s1097_s19, 4  ;;  %s26_s22 = sshll.u32 %s1098_s21, 4  ;;  %s89_s20 = int_to_ptr.vmem [resolvable:$true] %s88_s20  ;;  %s1193_s22 = int_to_ptr.vmem [resolvable:$true] %s26_s22 }
  0x28   :  { %s951_s27 = scalar_lea.hbm %s1398_s7, 256 }
  0x29   :  { %p952_p2 = scmp.ne.s32.totalorder %s1398_s7, %s951_s27  ;;  %p955_p3 = scmp.lt.u32.totalorder %s951_s27, %s1398_s7 }
  0x2b   :  { %p957_p4 = pnand %p955_p3, %p952_p2 }
  0x2d   :  { %960 = shalt.err (!%p957_p4)
}
  0x2e   :  { %s961_s4 = scalar_lea.vmem %s89_s20, 256  ;;  %p966_p6 = scmp.lt.s32.totalorder %s89_s20, %s89_s20 }
  0x2f   :  { %p962_p5 = scmp.ne.s32.totalorder %s89_s20, %s961_s4  ;;  %p967_p7 = scmp.lt.s32.totalorder %s961_s4, %s961_s4 }
  0x31   :  { %p968_p8 = por %p967_p7, %p966_p6 }
  0x33   :  { %p969_p9 = pnand %p968_p8, %p962_p5 }
  0x35   :  { %972 = shalt.err (!%p969_p9)
}
  0x36   :  { %s1099_s28 = smov 64   ;;  %s1100_s13 = smov 4  }
  0x37   :  { %94 = dma.hbm_to_vmem [thread:$0]  %s1398_s7, 256, %s89_s20, [#allocation12], %s1099_s28, %s1099_s28, %s1100_s13  }
  0x38   :  { %s973_s14 = scalar_lea.hbm %s1391_s0, 256 }
  0x39   :  { %p974_p10 = scmp.ne.s32.totalorder %s1391_s0, %s973_s14  ;;  %p977_p11 = scmp.lt.u32.totalorder %s973_s14, %s1391_s0 }
  0x3b   :  { %p979_p12 = pnand %p977_p11, %p974_p10 }
  0x3d   :  { %982 = shalt.err (!%p979_p12)
}
  0x3e   :  { %s983_s26 = scalar_lea.vmem %s1193_s22, 256  ;;  %p988_p0 = scmp.lt.s32.totalorder %s1193_s22, %s1193_s22 }
  0x3f   :  { %p984_p13 = scmp.ne.s32.totalorder %s1193_s22, %s983_s26  ;;  %p989_p1 = scmp.lt.s32.totalorder %s983_s26, %s983_s26 }
  0x41   :  { %p990_p2 = por %p989_p1, %p988_p0 }
  0x43   :  { %p991_p3 = pnand %p990_p2, %p984_p13 }
  0x45   :  { %994 = shalt.err (!%p991_p3)
}
  0x46   :  { %s1101_s7 = smov 128   ;;  %s1102_s20 = smov 8  }
  0x47   :  { %32 = dma.hbm_to_vmem [thread:$0]  %s1391_s0, 256, %s1193_s22, [#allocation3], %s1101_s7, %s1101_s7, %s1102_s20  }
  0x48   :  { %s1103_s30 = smov [#allocation7]   ;;  %s1104_s12 = smov [#allocation10]  }
  0x49   :  { %s50_s11 = sshll.u32 %s1103_s30, 4  ;;  %s74_s4 = sshll.u32 %s1104_s12, 4  ;;  %s51_s11 = int_to_ptr.vmem [resolvable:$true] %s50_s11  ;;  %s1227_s4 = int_to_ptr.vmem [resolvable:$true] %s74_s4 }
  0x4a   :  { %s995_s17 = scalar_lea.hbm %s1393_s2, 64 }
  0x4b   :  { %p996_p4 = scmp.ne.s32.totalorder %s1393_s2, %s995_s17  ;;  %p999_p5 = scmp.lt.u32.totalorder %s995_s17, %s1393_s2 }
  0x4d   :  { %p1001_p6 = pnand %p999_p5, %p996_p4 }
  0x4f   :  { %1004 = shalt.err (!%p1001_p6)
}
  0x50   :  { %s1005_s0 = scalar_lea.vmem %s51_s11, 64  ;;  %p1010_p8 = scmp.lt.s32.totalorder %s51_s11, %s51_s11 }
  0x51   :  { %p1006_p7 = scmp.ne.s32.totalorder %s51_s11, %s1005_s0  ;;  %p1011_p9 = scmp.lt.s32.totalorder %s1005_s0, %s1005_s0 }
  0x53   :  { %p1012_p10 = por %p1011_p9, %p1010_p8 }
  0x55   :  { %p1013_p11 = pnand %p1012_p10, %p1006_p7 }
  0x57   :  { %1016 = shalt.err (!%p1013_p11)
}
  0x58   :  { %56 = dma.hbm_to_vmem [thread:$0]  %s1393_s2, 64, %s51_s11, [#allocation6], %s1094_s23, %s1094_s23, %s1095_s24  }
  0x59   :  { %s1017_s7 = scalar_lea.hbm %s1396_s5, 1024 }
  0x5a   :  { %p1018_p12 = scmp.ne.s32.totalorder %s1396_s5, %s1017_s7  ;;  %p1021_p13 = scmp.lt.u32.totalorder %s1017_s7, %s1396_s5 }
  0x5c   :  { %p1023_p0 = pnand %p1021_p13, %p1018_p12 }
  0x5e   :  { %1026 = shalt.err (!%p1023_p0)
}
  0x5f   :  { %s1027_s12 = scalar_lea.vmem %s1227_s4, 1024  ;;  %p1032_p2 = scmp.lt.s32.totalorder %s1227_s4, %s1227_s4 }
  0x60   :  { %p1028_p1 = scmp.ne.s32.totalorder %s1227_s4, %s1027_s12  ;;  %p1033_p3 = scmp.lt.s32.totalorder %s1027_s12, %s1027_s12 }
  0x62   :  { %p1034_p4 = por %p1033_p3, %p1032_p2 }
  0x64   :  { %p1035_p5 = pnand %p1034_p4, %p1028_p1 }
  0x66   :  { %1038 = shalt.err (!%p1035_p5)
}
  0x67   :  { %80 = dma.hbm_to_vmem [thread:$0]  %s1396_s5, 1024, %s1227_s4, [#allocation9], %s1099_s28, %s1099_s28, %s1100_s13  }
  0x68   :  { %s1105_s11 = smov [#allocation13]   ;;  %s1039_s1 = scalar_lea.hbm %s1399_s8, 16 }
  0x69   :  { %s101_s15 = sshll.u32 %s1105_s11, 4  ;;  %p1040_p6 = scmp.ne.s32.totalorder %s1399_s8, %s1039_s1  ;;  %s102_s15 = int_to_ptr.vmem [resolvable:$true] %s101_s15 }
  0x6a   :  { %p1043_p7 = scmp.lt.u32.totalorder %s1039_s1, %s1399_s8 }
  0x6c   :  { %p1045_p8 = pnand %p1043_p7, %p1040_p6 }
  0x6e   :  { %1048 = shalt.err (!%p1045_p8)
}
  0x6f   :  { %s1049_s22 = scalar_lea.vmem %s102_s15, 16  ;;  %s1053_s5 = scalar_lea.vmem %s102_s15, 32 }
  0x70   :  { %p1050_p9 = scmp.ne.s32.totalorder %s102_s15, %s1049_s22  ;;  %p1054_p10 = scmp.lt.s32.totalorder %s102_s15, %s102_s15 }
  0x71   :  { %p1055_p11 = scmp.lt.s32.totalorder %s1053_s5, %s1049_s22 }
  0x73   :  { %p1056_p12 = por %p1055_p11, %p1054_p10 }
  0x75   :  { %p1057_p13 = pnand %p1056_p12, %p1050_p9 }
  0x77   :  { %1060 = shalt.err (!%p1057_p13)
}
  0x78   :  { %104 = dma.hbm_to_vmem [thread:$0]  %s1399_s8, 16, %s102_s15, [#allocation12]  }
  0x79   :  { %1083 = dma.done.wait [#allocation3], 256  }
  0x7a   :  { %1084 = vsyncadd [#allocation3], 4294967040 }
  0x7b   :  { %1085 = dma.done.wait [#allocation6], 128  }
  0x7c   :  { %1086 = vsyncadd [#allocation6], 4294967168 }
  0x7d   :  { %1087 = dma.done.wait [#allocation9], 1040  }
  0x7e   :  { %1088 = vsyncadd [#allocation9], 4294966256 }
  0x7f   :  { %1089 = dma.done.wait [#allocation12], 272  }
  0x80   :  { %1090 = vsyncadd [#allocation12], 4294967024  ;;  %v1106_v0 = vmov 0.0   ;;  %vm1107_vm0 = vmmov 0   ;;  %v871_v1 = vld [vmem:[%s1394_s3] sm:$0xff]   ;;  %v872_v2 = vld [vmem:[%s1394_s3 + $0x10] sm:$0xff]   ;;  %v258_v12 = vlaneseq }
  0x81   :  { %803 = vmatprep.subr.bf16.mxu0 %v1106_v0  ;;  %811 = vmatprep.subr.bf16.mxu1 %v1106_v0  ;;  %v873_v3 = vld [vmem:[%s1394_s3 + $0x8] sm:$0xff]   ;;  %v1292_v4 = vld [vmem:[#allocation5 + $0x2] sm:$0x3]  ;;  %vm148_vm1 = vcmask 261120   ;;  %v874_v5 = vld [vmem:[%s1394_s3 + $0x18] sm:$0xff]   ;;  %vm318_vm2 = vcmask 1041409  }
  0x82   :  { %807 = vmatprep.mubr.msk.bf16.mxu0 %vm1107_vm0, %v1106_v0  ;;  %815 = vmatprep.mubr.msk.bf16.mxu1 %vm1107_vm0, %v1106_v0  ;;  %v1298_v6 = vld [vmem:[#allocation2] sm:$0xff]  ;;  %v1300_v7 = vld [vmem:[#allocation2 + $0x8] sm:$0xff]  ;;  %v131_v8 = vpack.c.bf16 %v1292_v4, %v1292_v4  ;;  %v1108_v10 = vmov 1966171168   ;;  %v1314_v14 = vshrl.u32 %v258_v12, 7  ;;  %v309_v40 = vand.u32 127, %v258_v12 }
  0x83   :  { %804 = vmatpush3.bf16.msra.mxu0 %v871_v1  ;;  %812 = vmatpush3.bf16.msra.mxu1 %v872_v2  ;;  %v192_v9 = vpack.c.bf16 %v1300_v7, %v1298_v6  ;;  %v256_v11 = vunpack.c.l.s4 %v1108_v10  ;;  %v766_v33 = vld [vmem:[#allocation8] ss:$0 sm:$0xff]  ;;  %vm321_vm3 = vcmask 58368   ;;  %v1109_v48 = vmov 0   ;;  %v403_v2 = vld [vmem:[#allocation5] sm:$0x3] }
  0x84   :  { %805 = vmatprep.subr.bf16.mxu0 %v1106_v0  ;;  %813 = vmatprep.subr.bf16.mxu1 %v1106_v0  ;;  %v1318_v20 = vsub.s32 0, %v1314_v14  ;;  %v312_v42 = vsub.s32 %v309_v40, %v1314_v14  ;;  %v332_v49 = vsub.s32 1, %v1314_v14  ;;  %v875_v12 = vld [vmem:[#allocation10] sm:$0xff]   ;;  %vm454_vm4 = vcmask 523264  }
  0x85   :  { %v257_v13 = vunpack.c.0.s8 %v256_v11  ;;  %870 = vset.pattern.permute.xlu0 %v1109_v48  ;;  %869 = vset.pattern.permute.xlu1 %v1109_v48  ;;  %vm660_vm5 = vcmask 785408  }
  0x87   :  { %806 = vmatpush3.bf16.msra.mxu0 %v873_v3  ;;  %814 = vmatpush3.bf16.msra.mxu1 %v874_v5  ;;  %v260_v15 = vsub.s32 %v257_v13, %v1314_v14  ;;  %v876_v13 = vld [vmem:[#allocation10 + $0x8] sm:$0xff]   ;;  %v877_v14 = vld [vmem:[#allocation10 + $0x10] sm:$0xff]  }
  0x88   :  { %819 = vmatprep.subr.bf16.mxu0 %v1106_v0  ;;  %831 = vmatprep.subr.bf16.mxu1 %v1106_v0 }
  0x8a   :  { %808 = vmatmul.mubr.msk.bf16.vlgmr.msra.gmra.mrb[0].mxu0 %vm148_vm1, %v131_v8  ;;  %816 = vmatmul.mubr.msk.bf16.vlgmr.msra.gmra.mrb[0].mxu1 %vm148_vm1, %v192_v9 }
  0x8b   :  { %827 = vmatprep.mubr.msk.bf16.mxu0 %vm1107_vm0, %v1106_v0  ;;  %839 = vmatprep.mubr.msk.bf16.mxu1 %vm1107_vm0, %v1106_v0 }
  0x8c   :  { %820 = vmatpush3.bf16.msra.mxu0 %v875_v12 }
  0x8d   :  { %821 = vmatprep.subr.bf16.mxu0 %v1106_v0 }
  0x90   :  { %822 = vmatpush3.bf16.msra.mxu0 %v876_v13 }
  0x91   :  { %823 = vmatprep.subr.bf16.mxu0 %v1106_v0 }
  0x94   :  { %824 = vmatpush3.bf16.msra.mxu0 %v877_v14 }
  0x95   :  { %825 = vmatprep.subr.bf16.mxu0 %v1106_v0 }
 0x15d   :  { %v186_v16 = vpop.f32.mrb[0].mxu0  ;;  %v247_v19 = vpop.f32.mrb[0].mxu1 }
 0x15e   :  { %v261_v17 = vrot.slane %v186_v16, %v260_v15  ;;  %v809_v18 = vpop.f32.mrb[1].mxu0  ;;  %v817_v22 = vpop.f32.mrb[1].mxu1 }
 0x15f   :  { %v189_v21 = vpop.f32.mrb[2].mxu0  ;;  %v250_v26 = vpop.f32.mrb[2].mxu1 }
 0x160   :  { %v262_v23 = vcombine.high %v261_v17, %v261_v17  ;;  %v269_v24 = vrot.slane %v261_v17, %v260_v15  ;;  %v810_v25 = vpop.f32.mrb[3].mxu0  ;;  %v818_v27 = vpop.f32.mrb[3].mxu1 }
 0x162   :  { %v280_v28 = vrot.slane %v269_v24, %v1318_v20  ;;  %v276_v29 = vrot.slane %v262_v23, %v260_v15  ;;  %v878_v15 = vld [vmem:[#allocation10 + $0x18] sm:$0xff]  }
 0x163   :  { %826 = vmatpush3.bf16.msra.mxu0 %v878_v15 }
 0x164   :  { %v287_v30 = vadd.f32 %v280_v28, %v247_v19  ;;  %v284_v31 = vrot.slane %v276_v29, %v1318_v20  ;;  %843 = vmatprep.subr.bf16.mxu0 %v1106_v0 }
 0x166   :  { %885 = vtanh.f32 %v287_v30  ;;  %v288_v32 = vadd.f32 %v284_v31, %v250_v26 }
 0x168   :  { %887 = vtanh.f32 %v288_v32 }
 0x170   :  { %v886_v34 = vpop.eup %885 }
 0x171   :  { %v298_v35 = vmul.f32 %v886_v34, %v766_v33 }
 0x172   :  { %v888_v36 = vpop.eup %887 }
 0x173   :  { %v300_v37 = vsel %vm148_vm1, %v298_v35, 0.0  ;;  %v299_v38 = vmul.f32 %v888_v36, %v766_v33  ;;  %v767_v36 = vld [vmem:[%s1397_s6] ss:$0 sm:$0xff] }
 0x174   :  { %301 = vadd.xlane.f32.xlu0 %v300_v37 }
 0x175   :  { %v303_v39 = vsel %vm148_vm1, %v299_v38, 0.0 }
 0x178   :  { %304 = vadd.xlane.f32.xlu0 %v303_v39 }
 0x201   :  { %v302_v41 = vpop.xlane.xlu0 %301 }
 0x202   :  { %v313_v44 = vrot.slane %v302_v41, %v312_v42 }
 0x205   :  { %v305_v43 = vpop.xlane.xlu0 %304 }
 0x206   :  { %v317_v45 = vrot.slane %v305_v43, %v312_v42 }
 0x208   :  { %v319_v46 = vsel %vm318_vm2, %v317_v45, %v313_v44 }
 0x209   :  { %v322_v47 = vsel %vm321_vm3, %v319_v46, -inf }
 0x20a   :  { %323 = vmax.xlane.f32.xlu1 %v322_v47 }
 0x297   :  { %v324_v50 = vpop.xlane.xlu1 %323 }
 0x298   :  { %v329_v51 = vrot.slane %v324_v50, %v1318_v20  ;;  %v333_v52 = vrot.slane %v324_v50, %v332_v49 }
 0x29a   :  { %v336_v53 = vsub.f32 %v302_v41, %v329_v51  ;;  %v337_v54 = vsub.f32 %v305_v43, %v333_v52  ;;  %v404_v43 = vld [vmem:[#allocation7] sm:$0x3] }
 0x29c   :  { %v338_v55 = vmul.f32 1.442695, %v336_v53  ;;  %v340_v56 = vmul.f32 1.442695, %v337_v54  ;;  %v879_v54 = vld [vmem:[#allocation10 + $0x20] sm:$0xff]  }
 0x29d   :  { %832 = vmatpush3.bf16.msra.mxu1 %v879_v54 }
 0x29e   :  { %889 = vpow2.f32 %v338_v55  ;;  %v880_v55 = vld [vmem:[#allocation10 + $0x28] sm:$0xff]   ;;  %833 = vmatprep.subr.bf16.mxu1 %v1106_v0 }
 0x29f   :  { %891 = vpow2.f32 %v340_v56  ;;  %v881_v56 = vld [vmem:[#allocation10 + $0x30] sm:$0xff]  }
 0x2a1   :  { %834 = vmatpush3.bf16.msra.mxu1 %v880_v55 }
 0x2a2   :  { %835 = vmatprep.subr.bf16.mxu1 %v1106_v0 }
 0x2a5   :  { %836 = vmatpush3.bf16.msra.mxu1 %v881_v56 }
 0x2a6   :  { %837 = vmatprep.subr.bf16.mxu1 %v1106_v0 }
 0x2a8   :  { %v890_v57 = vpop.eup %889 }
 0x2a9   :  { %v892_v58 = vpop.eup %891  ;;  %345 = vperm.xlu1 %869, %v890_v57  }
 0x2aa   :  { %348 = vperm.xlu0 %870, %v892_v58  }
 0x328   :  { %v346_v59 = vpop.permute.xlu1 %345 }
 0x329   :  { %v349_v60 = vpop.permute.xlu0 %348  ;;  %v353_v61 = vrot.slane %v346_v59, %v312_v42  ;;  %v525_v59 = vld [vmem:[#allocation7 + $0x2] sm:$0x3] }
 0x32a   :  { %v357_v62 = vrot.slane %v349_v60, %v312_v42 }
 0x32c   :  { %v358_v63 = vsel %vm318_vm2, %v357_v62, %v353_v61 }
 0x32d   :  { %v360_v1 = vsel %vm321_vm3, %v358_v63, 0.0 }
 0x32e   :  { %361 = vadd.xlane.f32.xlu1 %v360_v1 }
 0x33f   :  { %410 = vrot.lane.b32.xlu1 %v403_v2, %s1094_s23 }
 0x3bb   :  { %v362_v3 = vpop.xlane.xlu1 %361 }
 0x3bc   :  { %893 = vrcp.f32 %v362_v3 }
 0x3c6   :  { %v894_v5 = vpop.eup %893 }
 0x3c7   :  { %v368_v8 = vrot.slane %v894_v5, %v1318_v20  ;;  %v372_v10 = vrot.slane %v894_v5, %v332_v49 }
 0x3c9   :  { %v375_v9 = vmul.f32 %v890_v57, %v368_v8  ;;  %v376_v11 = vmul.f32 %v892_v58, %v372_v10  ;;  %v882_v58 = vld [vmem:[#allocation10 + $0x38] sm:$0xff]  }
 0x3ca   :  { %838 = vmatpush3.bf16.msra.mxu1 %v882_v58 }
 0x3cb   :  { %379 = vperm.xlu0 %870, %v375_v9  }
 0x3cf   :  { %384 = vperm.xlu0 %870, %v376_v11  }
 0x44a   :  { %v380_v16 = vpop.permute.xlu0 %379 }
 0x44b   :  { %v387_v17 = vmul.f32 %v380_v16, %v1298_v6  ;;  %v411_v6 = vpop.permute.xlu1 %410 }
 0x44d   :  { %v389_v18 = vsel %vm148_vm1, %v387_v17, 0.0 }
 0x44e   :  { %v390_v19 = vrot.slane %v389_v18, 4  ;;  %v385_v20 = vpop.permute.xlu0 %384 }
 0x44f   :  { %v388_v21 = vmul.f32 %v385_v20, %v1300_v7 }
 0x450   :  { %v391_v22 = vadd.f32 %v390_v19, %v389_v18 }
 0x451   :  { %v396_v23 = vsel %vm148_vm1, %v388_v21, 0.0 }
 0x452   :  { %v392_v24 = vrot.slane %v391_v22, 2  ;;  %v397_v25 = vrot.slane %v396_v23, 4 }
 0x454   :  { %v393_v26 = vadd.f32 %v392_v24, %v391_v22  ;;  %v398_v27 = vadd.f32 %v397_v25, %v396_v23  ;;  %v883_v22 = vld [vmem:[#allocation11] sm:$0xff]   ;;  %v884_v23 = vld [vmem:[#allocation11 + $0x8] sm:$0xff]  }
 0x456   :  { %v399_v28 = vrot.slane %v398_v27, 2  ;;  %v394_v29 = vrot.slane %v393_v26, 1 }
 0x458   :  { %v400_v30 = vadd.f32 %v399_v28, %v398_v27  ;;  %v395_v32 = vadd.f32 %v394_v29, %v393_v26 }
 0x45a   :  { %v401_v31 = vrot.slane %v400_v30, 1 }
 0x45c   :  { %v402_v33 = vadd.f32 %v401_v31, %v400_v30 }
 0x45e   :  { %v407_v34 = vsel %vm318_vm2, %v402_v33, %v395_v32 }
 0x45f   :  { %v413_v35 = vsel %vm148_vm1, %v407_v34, %v411_v6  ;;  %v780_v6 = vld [vmem:[#allocation13] ss:$0 sm:$0xff] }
 0x460   :  { %v414_v7 = vpack.c.bf16 %v413_v35, %v413_v35 }
 0x462   :  { %828 = vmatmul.mubr.msk.bf16.vlgmr.msra.gmra.mrb[4].mxu0 %vm454_vm4, %v414_v7 }
 0x463   :  { %847 = vmatprep.mubr.msk.bf16.mxu0 %vm1107_vm0, %v1106_v0  ;;  %844 = vmatpush3.bf16.msra.mxu0 %v883_v22 }
 0x464   :  { %845 = vmatprep.subr.bf16.mxu0 %v1106_v0 }
 0x467   :  { %846 = vmatpush3.bf16.msra.mxu0 %v884_v23 }
 0x535   :  { %v492_v37 = vpop.f32.mrb[4].mxu0 }
 0x536   :  { %v493_v38 = vadd.f32 %v767_v36, %v492_v37  ;;  %v829_v39 = vpop.f32.mrb[5].mxu0 }
 0x537   :  { %v495_v40 = vpop.f32.mrb[6].mxu0 }
 0x538   :  { %895 = vtanh.f32 %v493_v38  ;;  %v830_v41 = vpop.f32.mrb[7].mxu0  ;;  %v498_v44 = vmul.f32 0.5, %v493_v38 }
 0x53a   :  { %897 = vtanh.f32 %v498_v44 }
 0x542   :  { %v896_v42 = vpop.eup %895 }
 0x543   :  { %509 = vrot.lane.b32.xlu0 %v896_v42, %s1099_s28 }
 0x544   :  { %v898_v45 = vpop.eup %897 }
 0x545   :  { %v500_v46 = vadd.f32 1.0, %v898_v45 }
 0x547   :  { %504 = vrot.lane.b32.xlu0 %v404_v43, %s1094_s23  ;;  %v501_v47 = vmul.f32 0.5, %v500_v46 }
 0x5b5   :  { %v510_v48 = vpop.permute.xlu0 %509 }
 0x5b6   :  { %v512_v49 = vmul.f32 %v510_v48, %v501_v47 }
 0x5b8   :  { %514 = vrot.lane.b32.xlu0 %v512_v49, %s1094_s23 }
 0x5b9   :  { %v505_v50 = vpop.permute.xlu0 %504 }
 0x5ba   :  { %v507_v51 = vmul.f32 %v505_v50, %v501_v47 }
 0x62a   :  { %v515_v52 = vpop.permute.xlu0 %514 }
 0x62b   :  { %v517_v53 = vadd.f32 %v515_v52, %v507_v51 }
 0x62d   :  { %899 = vtanh.f32 %v517_v53 }
 0x637   :  { %v900_v57 = vpop.eup %899 }
 0x638   :  { %520 = vrot.lane.b32.xlu0 %v900_v57, %s1099_s28 }
 0x63c   :  { %531 = vrot.lane.b32.xlu0 %v1292_v4, %s1094_s23  ;;  %v774_v4 = vld [vmem:[%s1397_s6 + $0x1] ss:$0 sm:$0xff] }
 0x640   :  { %626 = vrot.lane.b32.xlu0 %v525_v59, %s1094_s23 }
 0x6aa   :  { %v521_v60 = vpop.permute.xlu0 %520 }
 0x6ab   :  { %v523_v61 = vmul.f32 %v521_v60, %v501_v47 }
 0x6ad   :  { %527 = vrot.lane.b32.xlu1 %v523_v61, %s1094_s23 }
 0x6ae   :  { %v532_v62 = vpop.permute.xlu0 %531 }
 0x6b2   :  { %v627_v18 = vpop.permute.xlu0 %626 }
 0x71f   :  { %v528_v63 = vpop.permute.xlu1 %527 }
 0x720   :  { %v534_v1 = vsel %vm148_vm1, %v528_v63, %v532_v62 }
 0x721   :  { %v535_v2 = vpack.c.bf16 %v534_v1, %v534_v1 }
 0x723   :  { %840 = vmatmul.mubr.msk.bf16.vlgmr.msra.gmra.mrb[4].mxu1 %vm454_vm4, %v535_v2 }
 0x7f6   :  { %v614_v3 = vpop.f32.mrb[4].mxu1 }
 0x7f7   :  { %v615_v5 = vadd.f32 %v774_v4, %v614_v3  ;;  %v841_v8 = vpop.f32.mrb[5].mxu1 }
 0x7f8   :  { %v617_v9 = vpop.f32.mrb[6].mxu1 }
 0x7f9   :  { %901 = vtanh.f32 %v615_v5  ;;  %v842_v10 = vpop.f32.mrb[7].mxu1  ;;  %v620_v12 = vmul.f32 0.5, %v615_v5 }
 0x7fb   :  { %903 = vtanh.f32 %v620_v12 }
 0x803   :  { %v902_v11 = vpop.eup %901 }
 0x804   :  { %631 = vrot.lane.b32.xlu1 %v902_v11, %s1099_s28 }
 0x805   :  { %v904_v13 = vpop.eup %903 }
 0x806   :  { %v622_v14 = vadd.f32 1.0, %v904_v13 }
 0x808   :  { %v623_v15 = vmul.f32 0.5, %v622_v14 }
 0x80a   :  { %v629_v19 = vmul.f32 %v627_v18, %v623_v15 }
 0x876   :  { %v632_v16 = vpop.permute.xlu1 %631 }
 0x877   :  { %v634_v17 = vmul.f32 %v632_v16, %v623_v15 }
 0x879   :  { %636 = vrot.lane.b32.xlu1 %v634_v17, %s1094_s23 }
 0x8eb   :  { %v637_v20 = vpop.permute.xlu1 %636 }
 0x8ec   :  { %v639_v21 = vadd.f32 %v637_v20, %v629_v19 }
 0x8ee   :  { %905 = vtanh.f32 %v639_v21 }
 0x8f8   :  { %v906_v24 = vpop.eup %905 }
 0x8f9   :  { %642 = vrot.lane.b32.xlu0 %v906_v24, %s1099_s28 }
 0x96b   :  { %v643_v25 = vpop.permute.xlu0 %642 }
 0x96c   :  { %v645_v26 = vmul.f32 %v643_v25, %v623_v15 }
 0x96e   :  { %647 = vrot.lane.b32.xlu0 %v645_v26, %s1099_s28  ;;  %v663_v27 = vpack.c.bf16 %v645_v26, %v645_v26 }
 0x970   :  { %676 = vrot.lane.b32.xlu1 %v663_v27, %s1094_s23 }
 0x972   :  { %655 = vrot.lane.b32.xlu0 %v639_v21, %s1099_s28  ;;  %s1110_s28 = smov [#allocation14]  }
 0x973   :  { %s740_s11 = sshll.u32 %s1110_s28, 4  ;;  %s741_s11 = int_to_ptr.vmem [resolvable:$true] %s740_s11 }
 0x974   :  { %651 = vrot.lane.b32.xlu1 %v517_v53, %s1094_s23  ;;  %s1061_s23 = scalar_lea.vmem %s741_s11, 32  ;;  %p1066_p1 = scmp.lt.s32.totalorder %s741_s11, %s741_s11 }
 0x975   :  { %p1062_p0 = scmp.ne.s32.totalorder %s741_s11, %s1061_s23  ;;  %p1067_p2 = scmp.lt.s32.totalorder %s1061_s23, %s1061_s23 }
 0x977   :  { %p1068_p3 = por %p1067_p2, %p1066_p1 }
 0x979   :  { %p1069_p4 = pnand %p1068_p3, %p1062_p0 }
 0x9e0   :  { %v648_v28 = vpop.permute.xlu0 %647 }
 0x9e1   :  { %v658_v0 = vsel %vm148_vm1, %v528_v63, %v648_v28 }
 0x9e2   :  { %v677_v29 = vpop.permute.xlu1 %676 }
 0x9e3   :  { %848 = vmatmul.mubr.msk.bf16.vlgmr.msra.gmra.mrb[8].mxu0 %vm148_vm1, %v677_v29 }
 0x9e4   :  { %v656_v31 = vpop.permute.xlu0 %655 }
 0x9e6   :  { %v652_v30 = vpop.permute.xlu1 %651 }
 0x9e7   :  { %v659_v32 = vsel %vm454_vm4, %v658_v0, %v652_v30 }
 0x9e8   :  { %v661_v33 = vsel %vm660_vm5, %v659_v32, %v656_v31 }
 0x9e9   :  { %662 = vst [vmem:[%s1401_s10] sm:$0x3] %v661_v33 }
 0xab6   :  { %v727_v34 = vpop.f32.mrb[8].mxu0 }
 0xab7   :  { %v728_v35 = vadd.f32 %v780_v6, %v727_v34  ;;  %v849_v7 = vpop.f32.mrb[9].mxu0 }
 0xab8   :  { %v730_v36 = vpop.f32.mrb[10].mxu0 }
 0xab9   :  { %733 = vst [vmem:[#allocation14] sm:$0x3] %v728_v35  ;;  %v850_v37 = vpop.f32.mrb[11].mxu0 }
 0xaba   :  { %1072 = shalt.err (!%p1069_p4)
}
 0xabb   :  { %s1073_s10 = scalar_lea.hbm %s1400_s9, 32 }
 0xabc   :  { %p1074_p5 = scmp.ne.s32.totalorder %s1400_s9, %s1073_s10  ;;  %p1077_p6 = scmp.lt.u32.totalorder %s1073_s10, %s1400_s9 }
 0xabe   :  { %p1079_p7 = pnand %p1077_p6, %p1074_p5 }
 0xac0   :  { %1082 = shalt.err (!%p1079_p7)
}
 0xac1   :  { %743 = dma.vmem_to_hbm [thread:$0]  %s741_s11, 32, %s1400_s9, [#allocation4]  }
 0xac2   :  { %1091 = dma.done.wait [#allocation4], 32  }
 0xac3   :  { %1092 = vsyncadd [#allocation4], 4294967264 }
 0xac4   :  { %751 = vsyncpa [#allocation3], 1 }
 0xac5   :  { %752 = vsyncpa [#allocation6], 1 }
 0xac6   :  { %753 = vsyncpa [#allocation9], 1 }
 0xac7   :  { %754 = vsyncpa [#allocation12], 1 }
 0xac8   :  { %755 = vsyncpa [#allocation4], 1 }

</bundles_post_ra>
